<compile_context>
chip_gen: v5e
topology: v5e:2x2
jax: 0.10.0
libtpu: 0.0.40
codegen_flags: <defaults>
</compile_context>

<pallas_src>
import functools

import jax
import jax.numpy as jnp
from jax.experimental import pallas as pl
from jax.experimental.pallas import tpu as pltpu


def _round_up(x, m):
    return (x + m - 1) // m * m


def _mlp_eval_kernel(x_ref, w_ref, b_ref, o_ref, acc_ref, *, negative_slope):
    k = pl.program_id(2)

    @pl.when(k == 0)
    def _():
        acc_ref[...] = jnp.zeros_like(acc_ref)

    acc_ref[...] += jnp.dot(
        x_ref[...], w_ref[...], preferred_element_type=jnp.float32
    )

    @pl.when(k == pl.num_programs(2) - 1)
    def _():
        y = acc_ref[...] + b_ref[...].astype(jnp.float32)
        y = jnp.maximum(y, negative_slope * y)  # LeakyReLU(0.2): single vmax
        # Dropout in eval mode == identity.
        o_ref[...] = y.astype(o_ref.dtype)


def _mlp_train_kernel(x_ref, w_ref, b_ref, mask_ref, o_ref, acc_ref, *,
                      negative_slope, scale):
    k = pl.program_id(2)

    @pl.when(k == 0)
    def _():
        acc_ref[...] = jnp.zeros_like(acc_ref)

    acc_ref[...] += jnp.dot(
        x_ref[...], w_ref[...], preferred_element_type=jnp.float32
    )

    @pl.when(k == pl.num_programs(2) - 1)
    def _():
        y = acc_ref[...] + b_ref[...].astype(jnp.float32)
        y = jnp.maximum(y, negative_slope * y)  # LeakyReLU(0.2)
        # Inverted dropout: keep-mask in {0,1}, survivors rescaled by 1/(1-p).
        y = y * (mask_ref[...].astype(jnp.float32) * scale)
        o_ref[...] = y.astype(o_ref.dtype)


def mlp_block(x, w_t, b, *, do_rate=0.1, training=False, rng_key=None,
              negative_slope=0.2, compute_dtype=None,
              tm=256, tn=256, tk=256):
    """Forward of MLPBlock.

    x:   [B, in_dim]        float32
    w_t: [in_dim, out_dim]  float32 (transposed nn.Linear weight)
    b:   [1, out_dim]       float32
    """
    B, in_dim = x.shape
    out_dim = w_t.shape[1]
    out_dtype = x.dtype

    # Clamp tiles to the (padded) problem size; keep them (8,128)-aligned so
    # the BlockSpec divisibility constraint always holds and output stores
    # are lane-dense.
    tm = min(tm, _round_up(B, 8))
    tn = min(tn, _round_up(out_dim, 128))
    tk = min(tk, _round_up(in_dim, 128))
    Mp = _round_up(B, tm)
    Np = _round_up(out_dim, tn)
    Kp = _round_up(in_dim, tk)

    x_p = jnp.pad(x, ((0, Mp - B), (0, Kp - in_dim)))
    w_p = jnp.pad(w_t, ((0, Kp - in_dim), (0, Np - out_dim)))
    b_p = jnp.pad(b, ((0, 0), (0, Np - out_dim)))

    if compute_dtype is not None:
        # Narrow MXU operands (e.g. bf16 on v6e/v7x); accumulator + epilogue
        # remain float32.
        x_p = x_p.astype(compute_dtype)
        w_p = w_p.astype(compute_dtype)

    grid = (Mp // tm, Np // tn, Kp // tk)

    in_specs = [
        pl.BlockSpec((tm, tk), lambda i, j, k: (i, k)),   # x tile
        pl.BlockSpec((tk, tn), lambda i, j, k: (k, j)),   # w tile
        pl.BlockSpec((1, tn), lambda i, j, k: (0, j)),    # bias tile
    ]
    operands = [x_p, w_p, b_p]

    use_dropout = bool(training) and float(do_rate) > 0.0
    if use_dropout:
        if rng_key is None:
            rng_key = jax.random.PRNGKey(0)
        keep = jax.random.bernoulli(rng_key, 1.0 - float(do_rate), (Mp, Np))
        operands.append(keep.astype(jnp.float32))
        in_specs.append(pl.BlockSpec((tm, tn), lambda i, j, k: (i, j)))
        kernel = functools.partial(
            _mlp_train_kernel,
            negative_slope=float(negative_slope),
            scale=float(1.0 / (1.0 - float(do_rate))),
        )
    else:
        kernel = functools.partial(
            _mlp_eval_kernel, negative_slope=float(negative_slope)
        )

    bytes_accessed = sum(int(a.size) * a.dtype.itemsize for a in operands)
    bytes_accessed += Mp * Np * x.dtype.itemsize
    cost = pl.CostEstimate(
        flops=2 * Mp * Np * Kp,
        transcendentals=0,
        bytes_accessed=int(bytes_accessed),
    )

    out = pl.pallas_call(
        kernel,
        out_shape=jax.ShapeDtypeStruct((Mp, Np), out_dtype),
        grid_spec=pltpu.PrefetchScalarGridSpec(
            num_scalar_prefetch=0,
            grid=grid,
            in_specs=in_specs,
            out_specs=pl.BlockSpec((tm, tn), lambda i, j, k: (i, j)),
            scratch_shapes=[pltpu.VMEM((tm, tn), jnp.float32)],
        ),
        compiler_params=pltpu.CompilerParams(
            dimension_semantics=("parallel", "parallel", "arbitrary"),
            vmem_limit_bytes=32 * 1024 * 1024,
        ),
        cost_estimate=cost,
    )(*operands)

    return out[:B, :out_dim]


if __name__ == "__main__":
    # Small shapes consistent with MLPBlock(in_dim, out_dim, do_rates).
    B, in_dim, out_dim = 8, 32, 64
    do_rates = 0.1

    key = jax.random.PRNGKey(0)
    kx, kw, kb, kd = jax.random.split(key, 4)

    x = jax.random.normal(kx, (B, in_dim), dtype=jnp.float32)

    # Deterministic parameter init (Kaiming-uniform-like bound, as nn.Linear).
    bound = 1.0 / (in_dim ** 0.5)
    w = jax.random.uniform(kw, (out_dim, in_dim), minval=-bound, maxval=bound,
                           dtype=jnp.float32)
    b = jax.random.uniform(kb, (out_dim,), minval=-bound, maxval=bound,
                           dtype=jnp.float32)

    w_t = w.T                       # [in_dim, out_dim]
    b2d = b.reshape(1, out_dim)     # broadcast over batch in-kernel

    # ---- Eval mode (dropout = identity), f32 MXU operands -----------------
    out = mlp_block(x, w_t, b2d, do_rate=do_rates, training=False)
    out = jax.block_until_ready(out)

    ref = x @ w_t + b2d
    ref = jnp.maximum(ref, 0.2 * ref)
    assert out.shape == (B, out_dim)
    assert jnp.allclose(out, ref, atol=1e-5, rtol=1e-5)

    # ---- Eval mode, bf16 MXU feed (v6e/v7x fast path) ----------------------
    out_bf = mlp_block(x, w_t, b2d, do_rate=do_rates, training=False,
                       compute_dtype=jnp.bfloat16)
    out_bf = jax.block_until_ready(out_bf)
    ref_bf = jnp.dot(x.astype(jnp.bfloat16), w_t.astype(jnp.bfloat16),
                     preferred_element_type=jnp.float32) + b2d
    ref_bf = jnp.maximum(ref_bf, 0.2 * ref_bf)
    assert jnp.allclose(out_bf, ref_bf, atol=1e-2, rtol=1e-2)

    # ---- Training mode (inverted dropout) ----------------------------------
    out_tr = mlp_block(x, w_t, b2d, do_rate=do_rates, training=True,
                       rng_key=kd)
    out_tr = jax.block_until_ready(out_tr)
    assert out_tr.shape == (B, out_dim)
    scale = 1.0 / (1.0 - do_rates)
    is_dropped = jnp.isclose(out_tr, 0.0, atol=1e-6)
    is_kept = jnp.isclose(out_tr, ref * scale, atol=1e-4, rtol=1e-4)
    assert bool(jnp.all(is_dropped | is_kept))

    print("KERNEL_OK")
</pallas_src>

<mosaic_0001>
module attributes {stable_mosaic.version = 11 : i64} {
  func.func @_mlp_eval_kernel(%arg0: i32, %arg1: i32, %arg2: i32, %arg3: memref<8x128xf32, #tpu.memory_space<vmem>>, %arg4: memref<128x128xf32, #tpu.memory_space<vmem>>, %arg5: memref<1x128xf32, #tpu.memory_space<vmem>>, %arg6: memref<8x128xf32, #tpu.memory_space<vmem>>, %arg7: memref<8x128xf32, #tpu.memory_space<vmem>>) attributes {dimension_semantics = [#tpu.dimension_semantics<parallel>, #tpu.dimension_semantics<parallel>, #tpu.dimension_semantics<arbitrary>], iteration_bounds = array<i64: 1, 1, 1>, scalar_prefetch = 0 : i64, scratch_operands = 1 : i64, tpu.core_type = #tpu.core_type<tc>, window_params = [{transform_indices = @transform_0, window_bounds = array<i64: 8, 128>}, {transform_indices = @transform_1, window_bounds = array<i64: 128, 128>}, {transform_indices = @transform_2, window_bounds = array<i64: 1, 128>}, {transform_indices = @transform_3, window_bounds = array<i64: 8, 128>}]} {
    %c0_i32 = arith.constant 0 : i32
    %0 = arith.cmpi eq, %arg2, %c0_i32 : i32
    %1 = arith.extui %0 : i1 to i32
    %c0_i32_0 = arith.constant 0 : i32
    %2 = arith.cmpi ne, %1, %c0_i32_0 : i32
    scf.if %2 {
      %cst_10 = arith.constant 0.000000e+00 : f32
      %12 = vector.broadcast %cst_10 : f32 to vector<8x128xf32>
      %c0_11 = arith.constant 0 : index
      %c0_12 = arith.constant 0 : index
      %13 = vector.load %arg7[%c0_11, %c0_12] : memref<8x128xf32, #tpu.memory_space<vmem>>, vector<8x128xf32>
      tpu.vector_store %arg7[%c0_11, %c0_12], %12 {strides = array<i32>} : memref<8x128xf32, #tpu.memory_space<vmem>>, vector<8x128xf32>,
    } else {
    }
    %c0 = arith.constant 0 : index
    %c0_1 = arith.constant 0 : index
    %3 = vector.load %arg7[%c0, %c0_1] : memref<8x128xf32, #tpu.memory_space<vmem>>, vector<8x128xf32>
    %c0_2 = arith.constant 0 : index
    %c0_3 = arith.constant 0 : index
    %4 = vector.load %arg3[%c0_2, %c0_3] : memref<8x128xf32, #tpu.memory_space<vmem>>, vector<8x128xf32>
    %c0_4 = arith.constant 0 : index
    %c0_5 = arith.constant 0 : index
    %5 = vector.load %arg4[%c0_4, %c0_5] : memref<128x128xf32, #tpu.memory_space<vmem>>, vector<128x128xf32>
    %cst = arith.constant dense<0.000000e+00> : vector<8x128xf32>
    %6 = tpu.matmul %4, %5, %cst {dimension_numbers = #tpu.dot_dimension_numbers<[1], [0], [0], [1], [0, 0, 1, 1], [], []>} : vector<8x128xf32>, vector<128x128xf32>, vector<8x128xf32> -> vector<8x128xf32>
    %7 = arith.addf %3, %6 : vector<8x128xf32>
    %c0_6 = arith.constant 0 : index
    %c0_7 = arith.constant 0 : index
    %8 = vector.load %arg7[%c0_6, %c0_7] : memref<8x128xf32, #tpu.memory_space<vmem>>, vector<8x128xf32>
    tpu.vector_store %arg7[%c0_6, %c0_7], %7 {strides = array<i32>} : memref<8x128xf32, #tpu.memory_space<vmem>>, vector<8x128xf32>,
    %c0_i32_8 = arith.constant 0 : i32
    %9 = arith.cmpi eq, %arg2, %c0_i32_8 : i32
    %10 = arith.extui %9 : i1 to i32
    %c0_i32_9 = arith.constant 0 : i32
    %11 = arith.cmpi ne, %10, %c0_i32_9 : i32
    scf.if %11 {
      %c0_10 = arith.constant 0 : index
      %c0_11 = arith.constant 0 : index
      %12 = vector.load %arg7[%c0_10, %c0_11] : memref<8x128xf32, #tpu.memory_space<vmem>>, vector<8x128xf32>
      %c0_12 = arith.constant 0 : index
      %c0_13 = arith.constant 0 : index
      %13 = vector.load %arg5[%c0_12, %c0_13] : memref<1x128xf32, #tpu.memory_space<vmem>>, vector<1x128xf32>
      %14 = vector.broadcast %13 : vector<1x128xf32> to vector<8x128xf32>
      %15 = arith.addf %12, %14 : vector<8x128xf32>
      %cst_14 = arith.constant 2.000000e-01 : f32
      %16 = vector.broadcast %cst_14 : f32 to vector<8x128xf32>
      %17 = arith.mulf %16, %15 : vector<8x128xf32>
      %18 = arith.maximumf %15, %17 : vector<8x128xf32>
      %c0_15 = arith.constant 0 : index
      %c0_16 = arith.constant 0 : index
      %19 = vector.load %arg6[%c0_15, %c0_16] : memref<8x128xf32, #tpu.memory_space<vmem>>, vector<8x128xf32>
      tpu.vector_store %arg6[%c0_15, %c0_16], %18 {strides = array<i32>} : memref<8x128xf32, #tpu.memory_space<vmem>>, vector<8x128xf32>,
    } else {
    }
    return
  }
  func.func @transform_0(%arg0: i32, %arg1: i32, %arg2: i32) -> (i32, i32) {
    %c0_i32 = arith.constant 0 : i32
    return %arg0, %arg2 : i32, i32
  }
  func.func @transform_1(%arg0: i32, %arg1: i32, %arg2: i32) -> (i32, i32) {
    %c0_i32 = arith.constant 0 : i32
    return %arg2, %arg1 : i32, i32
  }
  func.func @transform_2(%arg0: i32, %arg1: i32, %arg2: i32) -> (i32, i32) {
    %c0_i32 = arith.constant 0 : i32
    %c0_i32_0 = arith.constant 0 : i32
    return %c0_i32, %arg1 : i32, i32
  }
  func.func @transform_3(%arg0: i32, %arg1: i32, %arg2: i32) -> (i32, i32) {
    %c0_i32 = arith.constant 0 : i32
    return %arg0, %arg1 : i32, i32
  }
}

</mosaic_0001>

<bundles_post_ra>
// kernel: tpu_custom_call.1
= control target key start
LH: loop header
LB: loop body
LE: loop exit
PB: predicated region body
PF: predicated region fallthrough
CT: control target
= control target key end

     0   :  { %8 = vsyncpa [#allocation4], 0  ;;  %s241_s0 = inlined_call_operand.hbm [shape: f32[8,128], index: 0, kind: input, shape index: {}]   ;;  %s242_s1 = inlined_call_operand.hbm [shape: f32[128,128], index: 1, kind: input, shape index: {}]   ;;  %s243_s2 = inlined_call_operand.vmem [shape: f32[1,128], index: 2, kind: input, shape index: {}]   ;;  %s244_s3 = inlined_call_operand.hbm [shape: f32[8,128], index: 3, kind: output, shape index: {}]  }
   0x1   :  { %9 = vsyncpa [#allocation7], 0 }
   0x2   :  { %10 = vsyncpa [#allocation5], 0  ;;  %s16_s14 = sshll.u32 %s241_s0, 4  ;;  %s204_s15 = smov [#allocation3]   ;;  %s17_s14 = int_to_ptr.hbm [resolvable:$true] %s16_s14 }
   0x3   :  { %s18_s16 = sshll.u32 %s204_s15, 4  ;;  %s26_s19 = sshll.u32 %s242_s1, 4  ;;  %s19_s16 = int_to_ptr.vmem [resolvable:$true] %s18_s16  ;;  %s27_s19 = int_to_ptr.hbm [resolvable:$true] %s26_s19 }
   0x4   :  { %21 = dma.hbm_to_vmem [thread:$0]  %s17_s14, 128, %s19_s16, [#allocation4]  }
   0x5   :  { %s205_s20 = smov [#allocation6]   ;;  %s206_s22 = smov 128  }
   0x6   :  { %s28_s21 = sshll.u32 %s205_s20, 4  ;;  %s207_s23 = smov 8   ;;  %s29_s21 = int_to_ptr.vmem [resolvable:$true] %s28_s21 }
   0x7   :  { %34 = dma.hbm_to_vmem [thread:$0]  %s27_s19, 2048, %s29_s21, [#allocation7], %s206_s22, %s206_s22, %s207_s23  }
   0x8   :  { %198 = dma.done.wait [#allocation4], 128  }
   0x9   :  { %199 = vsyncadd [#allocation4], 4294967168 }
   0xa   :  { %200 = dma.done.wait [#allocation7], 2048  }
   0xb   :  { %201 = vsyncadd [#allocation7], 4294965248  ;;  %v67_v0 = vld [vmem:[#allocation6 + $0x78] sm:$0xff]  ;;  %v66_v1 = vld [vmem:[#allocation6 + $0x70] sm:$0xff]  ;;  %s208_s24 = smov [#allocation8]   ;;  %s109_s28 = sshll.u32 %s244_s3, 4  ;;  %s110_s28 = int_to_ptr.hbm [resolvable:$true] %s109_s28 }
   0xc   :  { %68 = vmatpush.msra.mxu0 %v67_v0  ;;  %v65_v2 = vld [vmem:[#allocation6 + $0x68] sm:$0xff]  ;;  %v64_v3 = vld [vmem:[#allocation6 + $0x60] sm:$0xff]  ;;  %v63_v4 = vld [vmem:[#allocation6 + $0x58] sm:$0xff]  ;;  %s107_s25 = sshll.u32 %s208_s24, 4  ;;  %s108_s25 = int_to_ptr.vmem [resolvable:$true] %s107_s25 }
   0xd   :  { %v62_v5 = vld [vmem:[#allocation6 + $0x50] sm:$0xff]  ;;  %v61_v6 = vld [vmem:[#allocation6 + $0x48] sm:$0xff]  ;;  %v60_v7 = vld [vmem:[#allocation6 + $0x40] sm:$0xff] }
   0xe   :  { %69 = vmatpush.msra.mxu0 %v66_v1  ;;  %v59_v8 = vld [vmem:[#allocation6 + $0x38] sm:$0xff]  ;;  %v58_v9 = vld [vmem:[#allocation6 + $0x30] sm:$0xff]  ;;  %v57_v10 = vld [vmem:[#allocation6 + $0x28] sm:$0xff] }
   0xf   :  { %v56_v11 = vld [vmem:[#allocation6 + $0x20] sm:$0xff]  ;;  %v55_v12 = vld [vmem:[#allocation6 + $0x18] sm:$0xff]  ;;  %v54_v13 = vld [vmem:[#allocation6 + $0x10] sm:$0xff] }
  0x10   :  { %70 = vmatpush.msra.mxu0 %v65_v2  ;;  %v53_v14 = vld [vmem:[#allocation6 + $0x8] sm:$0xff]  ;;  %v52_v15 = vld [vmem:[#allocation6] sm:$0xff]  ;;  %v51_v16 = vld [vmem:[#allocation3] sm:$0xff] }
  0x11   :  { %v125_v17 = vld [vmem:[%s243_s2] ss:$0 sm:$0xff] }
  0x12   :  { %71 = vmatpush.msra.mxu0 %v64_v3 }
  0x14   :  { %72 = vmatpush.msra.mxu0 %v63_v4 }
  0x16   :  { %73 = vmatpush.msra.mxu0 %v62_v5 }
  0x18   :  { %74 = vmatpush.msra.mxu0 %v61_v6 }
  0x1a   :  { %75 = vmatpush.msra.mxu0 %v60_v7 }
  0x1c   :  { %76 = vmatpush.msra.mxu0 %v59_v8 }
  0x1e   :  { %77 = vmatpush.msra.mxu0 %v58_v9 }
  0x20   :  { %78 = vmatpush.msra.mxu0 %v57_v10 }
  0x22   :  { %79 = vmatpush.msra.mxu0 %v56_v11 }
  0x24   :  { %80 = vmatpush.msra.mxu0 %v55_v12 }
  0x26   :  { %81 = vmatpush.msra.mxu0 %v54_v13 }
  0x28   :  { %82 = vmatpush.msra.mxu0 %v53_v14 }
  0x2a   :  { %83 = vmatpush.msra.mxu0 %v52_v15 }
  0x2b   :  { %84 = vmatmul.f32.vlgmr.msra.gmra.mxu0 %v51_v16 }
  0xa8   :  { %v85_v18 = vpop.f32.mrf.mxu0 }
  0xa9   :  { %v98_v19 = vadd.f32 %v125_v17, %v85_v18 }
  0xab   :  { %v99_v20 = vmul.f32 0.2, %v98_v19 }
  0xad   :  { %v100_v21 = vmax.f32 %v98_v19, %v99_v20 }
  0xaf   :  { %101 = vst [vmem:[#allocation8] sm:$0xff] %v100_v21 }
  0xb0   :  { %112 = dma.vmem_to_hbm [thread:$0]  %s108_s25, 128, %s110_s28, [#allocation5]  }
  0xb1   :  { %202 = dma.done.wait [#allocation5], 128  }
  0xb2   :  { %203 = vsyncadd [#allocation5], 4294967168 }
  0xb3   :  { %117 = vsyncpa [#allocation4], 1 }
  0xb4   :  { %118 = vsyncpa [#allocation7], 1 }
  0xb5   :  { %119 = vsyncpa [#allocation5], 1 }

</bundles_post_ra>
